<compile_context>
chip_gen: v7x
topology: tpu7x:2x2x1
jax: 0.10.0
libtpu: 0.0.40
codegen_flags: <defaults>
</compile_context>

<pallas_src>
import functools

import jax
import jax.numpy as jnp
import numpy as np
from jax.experimental import pallas as pl
from jax.experimental.pallas import tpu as pltpu


def pointnet_kernel(x_ref, w1_ref, b1_ref, w2_ref, b2_ref,
                    w3a_ref, w3b_ref, b3_ref, w4_ref, b4_ref,
                    gf_ref, feat_ref, *, bt, n, c):
    # x_ref: (bt, n, 3); weights pre-transposed to (C_in, C_out); biases (1, C_out).
    # All reshapes below only merge/split the leading (sublane-aligned, n % 8 == 0
    # when bt > 1) dims, so they are layout-preserving views.
    x = x_ref[...].reshape(bt * n, 3)                                   # (bt*n, 3)

    # conv1 (1x1) + ReLU: (bt*n, 3) @ (3, 32)
    h1 = jnp.dot(x, w1_ref[...], preferred_element_type=jnp.float32) + b1_ref[...]
    h1 = jnp.maximum(h1, 0.0)

    # conv2 (1x1): (bt*n, 32) @ (32, C)
    h2 = jnp.dot(h1, w2_ref[...], preferred_element_type=jnp.float32) + b2_ref[...]

    # per-sample global max over points (PyTorch dim=2 in NCW layout)
    h2_3 = h2.reshape(bt, n, c)                                         # (bt, n, C)
    g = jnp.max(h2_3, axis=1)                                           # (bt, C)

    # conv3 on concat([h2, broadcast(g)], channel axis) as an exact split matmul:
    #   [h2 | g] @ W3^T == h2 @ W3a^T + g @ W3b^T
    # The global term (+ bias) is computed once per grid step and broadcast.
    gterm = (jnp.dot(g, w3b_ref[...], preferred_element_type=jnp.float32)
             + b3_ref[...])                                             # (bt, C)
    loc = jnp.dot(h2, w3a_ref[...], preferred_element_type=jnp.float32) # (bt*n, C)
    h3 = jnp.maximum(loc.reshape(bt, n, c) + gterm.reshape(bt, 1, c), 0.0)

    # conv4 (1x1)
    h4 = (jnp.dot(h3.reshape(bt * n, c), w4_ref[...],
                  preferred_element_type=jnp.float32) + b4_ref[...])
    h4 = h4.reshape(bt, n, c)                                           # (bt, n, C)

    feat_ref[...] = h4
    gf_ref[...] = jnp.max(h4, axis=1, keepdims=True)                    # (bt, 1, C)


def _choose_block_batch(B, N, row_cap=4096):
    """Largest divisor bt of B with bt*N <= row_cap (VMEM budget ~16 MiB of
    blocks+intermediates), preferring >= 2 grid steps so the 'parallel' batch
    axis can shard across both v7x TensorCores.  bt > 1 only when N is
    sublane-aligned so the in-kernel reshapes stay layout-preserving."""
    if N % 8 != 0:
        return 1
    divisors = [d for d in range(1, B + 1) if B % d == 0 and d * N <= row_cap]
    if not divisors:
        return 1
    multi_step = [d for d in divisors if B // d >= 2]
    return max(multi_step) if multi_step else max(divisors)


def init_params(output_size=32, seed=0):
    """Deterministic synthetic parameters (PyTorch Conv1d weight: (C_out, C_in, 1))."""
    keys = jax.random.split(jax.random.PRNGKey(seed), 8)
    C = output_size

    def conv_params(kw, kb, c_in, c_out):
        bound = 1.0 / np.sqrt(c_in)
        w = jax.random.uniform(kw, (c_out, c_in), jnp.float32, -bound, bound)
        b = jax.random.uniform(kb, (c_out,), jnp.float32, -bound, bound)
        return w, b

    w1, b1 = conv_params(keys[0], keys[1], 3, 32)
    w2, b2 = conv_params(keys[2], keys[3], 32, C)
    w3, b3 = conv_params(keys[4], keys[5], 2 * C, C)
    w4, b4 = conv_params(keys[6], keys[7], C, C)
    return dict(w1=w1, b1=b1, w2=w2, b2=b2, w3=w3, b3=b3, w4=w4, b4=b4)


@functools.partial(jax.jit, static_argnames=("output_size",))
def pointnet_encoder_forward(x, params, output_size=32):
    """x: (B, N, 3) float32 -> (global_feature (B, C), point_features (B, N, C))."""
    B, N, _ = x.shape
    C = output_size
    bt = _choose_block_batch(B, N)
    # TODO(synk): for very large N (single-batch block would overflow VMEM) the
    # points axis should also be tiled with a two-pass max; not needed here.

    # Glue: pre-transpose weights to (C_in, C_out); split conv3 weight into the
    # local (first C input channels) and global (last C) halves, matching the
    # channel order of torch.cat((x, global), dim=1).
    w1_t = params["w1"].T                       # (3, 32)
    w2_t = params["w2"].T                       # (32, C)
    w3a_t = params["w3"][:, :C].T               # (C, C)  local half
    w3b_t = params["w3"][:, C:].T               # (C, C)  global half
    w4_t = params["w4"].T                       # (C, C)
    b1 = params["b1"].reshape(1, -1)
    b2 = params["b2"].reshape(1, -1)
    b3 = params["b3"].reshape(1, -1)
    b4 = params["b4"].reshape(1, -1)

    weight_spec = lambda shape: pl.BlockSpec(shape, lambda i: (0, 0))
    kernel = functools.partial(pointnet_kernel, bt=bt, n=N, c=C)

    gf3, feat = pl.pallas_call(
        kernel,
        out_shape=(
            jax.ShapeDtypeStruct((B, 1, C), jnp.float32),
            jax.ShapeDtypeStruct((B, N, C), jnp.float32),
        ),
        grid_spec=pltpu.PrefetchScalarGridSpec(
            num_scalar_prefetch=0,
            grid=(B // bt,),
            in_specs=[
                pl.BlockSpec((bt, N, 3), lambda i: (i, 0, 0)),
                weight_spec((3, 32)), weight_spec((1, 32)),
                weight_spec((32, C)), weight_spec((1, C)),
                weight_spec((C, C)), weight_spec((C, C)), weight_spec((1, C)),
                weight_spec((C, C)), weight_spec((1, C)),
            ],
            out_specs=[
                pl.BlockSpec((bt, 1, C), lambda i: (i, 0, 0)),
                pl.BlockSpec((bt, N, C), lambda i: (i, 0, 0)),
            ],
        ),
        compiler_params=pltpu.CompilerParams(
            dimension_semantics=("parallel",),
            vmem_limit_bytes=48 * 1024 * 1024),
    )(x, w1_t, b1, w2_t, b2, w3a_t, w3b_t, b3, w4_t, b4)

    return gf3.reshape(B, C), feat


def reference_forward(x, params, output_size=32):
    """Pure-JAX reference reproducing the PyTorch forward exactly."""
    C = output_size
    B, N, _ = x.shape
    xc = jnp.transpose(x, (0, 2, 1))                                  # (B, 3, N)
    h = jnp.einsum("oc,bcn->bon", params["w1"], xc) + params["b1"][None, :, None]
    h = jax.nn.relu(h)
    h = jnp.einsum("oc,bcn->bon", params["w2"], h) + params["b2"][None, :, None]
    g = jnp.max(h, axis=2)                                            # (B, C)
    cat = jnp.concatenate([h, jnp.broadcast_to(g[:, :, None], (B, C, N))], axis=1)
    h = jnp.einsum("oc,bcn->bon", params["w3"], cat) + params["b3"][None, :, None]
    h = jax.nn.relu(h)
    h = jnp.einsum("oc,bcn->bon", params["w4"], h) + params["b4"][None, :, None]
    g = jnp.max(h, axis=2)
    return g, jnp.transpose(h, (0, 2, 1))


if __name__ == "__main__":
    B, N, OUTPUT_SIZE = 4, 64, 32
    key = jax.random.PRNGKey(0)
    x = jax.random.normal(key, (B, N, 3), dtype=jnp.float32)
    params = init_params(output_size=OUTPUT_SIZE, seed=0)

    gf, feat = pointnet_encoder_forward(x, params, output_size=OUTPUT_SIZE)
    gf, feat = jax.block_until_ready((gf, feat))

    gf_ref, feat_ref = reference_forward(x, params, output_size=OUTPUT_SIZE)
    assert gf.shape == (B, OUTPUT_SIZE) and feat.shape == (B, N, OUTPUT_SIZE)
    np.testing.assert_allclose(np.asarray(gf), np.asarray(gf_ref), rtol=1e-5, atol=1e-5)
    np.testing.assert_allclose(np.asarray(feat), np.asarray(feat_ref), rtol=1e-5, atol=1e-5)

    print("KERNEL_OK")
</pallas_src>

<mosaic_0001>
module attributes {stable_mosaic.version = 11 : i64} {
  func.func @pointnet_kernel(%arg0: i32, %arg1: memref<2x64x3xf32, #tpu.memory_space<vmem>>, %arg2: memref<3x32xf32, #tpu.memory_space<vmem>>, %arg3: memref<1x32xf32, #tpu.memory_space<vmem>>, %arg4: memref<32x32xf32, #tpu.memory_space<vmem>>, %arg5: memref<1x32xf32, #tpu.memory_space<vmem>>, %arg6: memref<32x32xf32, #tpu.memory_space<vmem>>, %arg7: memref<32x32xf32, #tpu.memory_space<vmem>>, %arg8: memref<1x32xf32, #tpu.memory_space<vmem>>, %arg9: memref<32x32xf32, #tpu.memory_space<vmem>>, %arg10: memref<1x32xf32, #tpu.memory_space<vmem>>, %arg11: memref<2x1x32xf32, #tpu.memory_space<vmem>>, %arg12: memref<2x64x32xf32, #tpu.memory_space<vmem>>) attributes {dimension_semantics = [#tpu.dimension_semantics<parallel>], iteration_bounds = array<i64: 2>, scalar_prefetch = 0 : i64, scratch_operands = 0 : i64, tpu.core_type = #tpu.core_type<tc>, window_params = [{transform_indices = @transform_0, window_bounds = array<i64: 2, 64, 3>}, {pipeline_mode = #tpu.pipeline_mode<synchronous>, transform_indices = @transform_1, window_bounds = array<i64: 3, 32>}, {pipeline_mode = #tpu.pipeline_mode<synchronous>, transform_indices = @transform_2, window_bounds = array<i64: 1, 32>}, {pipeline_mode = #tpu.pipeline_mode<synchronous>, transform_indices = @transform_3, window_bounds = array<i64: 32, 32>}, {pipeline_mode = #tpu.pipeline_mode<synchronous>, transform_indices = @transform_4, window_bounds = array<i64: 1, 32>}, {pipeline_mode = #tpu.pipeline_mode<synchronous>, transform_indices = @transform_5, window_bounds = array<i64: 32, 32>}, {pipeline_mode = #tpu.pipeline_mode<synchronous>, transform_indices = @transform_6, window_bounds = array<i64: 32, 32>}, {pipeline_mode = #tpu.pipeline_mode<synchronous>, transform_indices = @transform_7, window_bounds = array<i64: 1, 32>}, {pipeline_mode = #tpu.pipeline_mode<synchronous>, transform_indices = @transform_8, window_bounds = array<i64: 32, 32>}, {pipeline_mode = #tpu.pipeline_mode<synchronous>, transform_indices = @transform_9, window_bounds = array<i64: 1, 32>}, {transform_indices = @transform_10, window_bounds = array<i64: 2, 1, 32>}, {transform_indices = @transform_11, window_bounds = array<i64: 2, 64, 32>}]} {
    %c0 = arith.constant 0 : index
    %c0_0 = arith.constant 0 : index
    %c0_1 = arith.constant 0 : index
    %0 = vector.load %arg1[%c0, %c0_0, %c0_1] : memref<2x64x3xf32, #tpu.memory_space<vmem>>, vector<2x64x3xf32>
    %1 = vector.shape_cast %0 : vector<2x64x3xf32> to vector<128x3xf32>
    %c0_2 = arith.constant 0 : index
    %c0_3 = arith.constant 0 : index
    %2 = vector.load %arg2[%c0_2, %c0_3] : memref<3x32xf32, #tpu.memory_space<vmem>>, vector<3x32xf32>
    %cst = arith.constant dense<0.000000e+00> : vector<128x32xf32>
    %3 = tpu.matmul %1, %2, %cst {dimension_numbers = #tpu.dot_dimension_numbers<[1], [0], [0], [1], [0, 0, 1, 1], [], []>} : vector<128x3xf32>, vector<3x32xf32>, vector<128x32xf32> -> vector<128x32xf32>
    %c0_4 = arith.constant 0 : index
    %c0_5 = arith.constant 0 : index
    %4 = vector.load %arg3[%c0_4, %c0_5] : memref<1x32xf32, #tpu.memory_space<vmem>>, vector<1x32xf32>
    %5 = vector.broadcast %4 : vector<1x32xf32> to vector<128x32xf32>
    %6 = arith.addf %3, %5 : vector<128x32xf32>
    %cst_6 = arith.constant 0.000000e+00 : f32
    %7 = vector.broadcast %cst_6 : f32 to vector<128x32xf32>
    %8 = arith.maximumf %6, %7 : vector<128x32xf32>
    %c0_7 = arith.constant 0 : index
    %c0_8 = arith.constant 0 : index
    %9 = vector.load %arg4[%c0_7, %c0_8] : memref<32x32xf32, #tpu.memory_space<vmem>>, vector<32x32xf32>
    %cst_9 = arith.constant dense<0.000000e+00> : vector<128x32xf32>
    %10 = tpu.matmul %8, %9, %cst_9 {dimension_numbers = #tpu.dot_dimension_numbers<[1], [0], [0], [1], [0, 0, 1, 1], [], []>} : vector<128x32xf32>, vector<32x32xf32>, vector<128x32xf32> -> vector<128x32xf32>
    %c0_10 = arith.constant 0 : index
    %c0_11 = arith.constant 0 : index
    %11 = vector.load %arg5[%c0_10, %c0_11] : memref<1x32xf32, #tpu.memory_space<vmem>>, vector<1x32xf32>
    %12 = vector.broadcast %11 : vector<1x32xf32> to vector<128x32xf32>
    %13 = arith.addf %10, %12 : vector<128x32xf32>
    %14 = vector.shape_cast %13 : vector<128x32xf32> to vector<2x64x32xf32>
    %cst_12 = arith.constant dense<0xFF800000> : vector<2x32xf32>
    %15 = vector.multi_reduction <maximumf>, %14, %cst_12 [1] : vector<2x64x32xf32> to vector<2x32xf32>
    %c0_13 = arith.constant 0 : index
    %c0_14 = arith.constant 0 : index
    %16 = vector.load %arg7[%c0_13, %c0_14] : memref<32x32xf32, #tpu.memory_space<vmem>>, vector<32x32xf32>
    %cst_15 = arith.constant dense<0.000000e+00> : vector<2x32xf32>
    %17 = tpu.matmul %15, %16, %cst_15 {dimension_numbers = #tpu.dot_dimension_numbers<[1], [0], [0], [1], [0, 0, 1, 1], [], []>} : vector<2x32xf32>, vector<32x32xf32>, vector<2x32xf32> -> vector<2x32xf32>
    %c0_16 = arith.constant 0 : index
    %c0_17 = arith.constant 0 : index
    %18 = vector.load %arg8[%c0_16, %c0_17] : memref<1x32xf32, #tpu.memory_space<vmem>>, vector<1x32xf32>
    %19 = vector.broadcast %18 : vector<1x32xf32> to vector<2x32xf32>
    %20 = arith.addf %17, %19 : vector<2x32xf32>
    %c0_18 = arith.constant 0 : index
    %c0_19 = arith.constant 0 : index
    %21 = vector.load %arg6[%c0_18, %c0_19] : memref<32x32xf32, #tpu.memory_space<vmem>>, vector<32x32xf32>
    %cst_20 = arith.constant dense<0.000000e+00> : vector<128x32xf32>
    %22 = tpu.matmul %13, %21, %cst_20 {dimension_numbers = #tpu.dot_dimension_numbers<[1], [0], [0], [1], [0, 0, 1, 1], [], []>} : vector<128x32xf32>, vector<32x32xf32>, vector<128x32xf32> -> vector<128x32xf32>
    %23 = vector.shape_cast %22 : vector<128x32xf32> to vector<2x64x32xf32>
    %24 = vector.shape_cast %20 : vector<2x32xf32> to vector<2x1x32xf32>
    %25 = vector.broadcast %24 : vector<2x1x32xf32> to vector<2x64x32xf32>
    %26 = arith.addf %23, %25 : vector<2x64x32xf32>
    %cst_21 = arith.constant 0.000000e+00 : f32
    %27 = vector.broadcast %cst_21 : f32 to vector<2x64x32xf32>
    %28 = arith.maximumf %26, %27 : vector<2x64x32xf32>
    %29 = vector.shape_cast %28 : vector<2x64x32xf32> to vector<128x32xf32>
    %c0_22 = arith.constant 0 : index
    %c0_23 = arith.constant 0 : index
    %30 = vector.load %arg9[%c0_22, %c0_23] : memref<32x32xf32, #tpu.memory_space<vmem>>, vector<32x32xf32>
    %cst_24 = arith.constant dense<0.000000e+00> : vector<128x32xf32>
    %31 = tpu.matmul %29, %30, %cst_24 {dimension_numbers = #tpu.dot_dimension_numbers<[1], [0], [0], [1], [0, 0, 1, 1], [], []>} : vector<128x32xf32>, vector<32x32xf32>, vector<128x32xf32> -> vector<128x32xf32>
    %c0_25 = arith.constant 0 : index
    %c0_26 = arith.constant 0 : index
    %32 = vector.load %arg10[%c0_25, %c0_26] : memref<1x32xf32, #tpu.memory_space<vmem>>, vector<1x32xf32>
    %33 = vector.broadcast %32 : vector<1x32xf32> to vector<128x32xf32>
    %34 = arith.addf %31, %33 : vector<128x32xf32>
    %35 = vector.shape_cast %34 : vector<128x32xf32> to vector<2x64x32xf32>
    %c0_27 = arith.constant 0 : index
    %c0_28 = arith.constant 0 : index
    %c0_29 = arith.constant 0 : index
    %36 = vector.load %arg12[%c0_27, %c0_28, %c0_29] : memref<2x64x32xf32, #tpu.memory_space<vmem>>, vector<2x64x32xf32>
    tpu.vector_store %arg12[%c0_27, %c0_28, %c0_29], %35 {strides = array<i32>} : memref<2x64x32xf32, #tpu.memory_space<vmem>>, vector<2x64x32xf32>,
    %cst_30 = arith.constant dense<0xFF800000> : vector<2x32xf32>
    %37 = vector.multi_reduction <maximumf>, %35, %cst_30 [1] : vector<2x64x32xf32> to vector<2x32xf32>
    %38 = vector.shape_cast %37 : vector<2x32xf32> to vector<2x1x32xf32>
    %c0_31 = arith.constant 0 : index
    %c0_32 = arith.constant 0 : index
    %c0_33 = arith.constant 0 : index
    %39 = vector.load %arg11[%c0_31, %c0_32, %c0_33] : memref<2x1x32xf32, #tpu.memory_space<vmem>>, vector<2x1x32xf32>
    tpu.vector_store %arg11[%c0_31, %c0_32, %c0_33], %38 {strides = array<i32>} : memref<2x1x32xf32, #tpu.memory_space<vmem>>, vector<2x1x32xf32>,
    return
  }
  func.func @transform_0(%arg0: i32) -> (i32, i32, i32) {
    %c0_i32 = arith.constant 0 : i32
    %c0_i32_0 = arith.constant 0 : i32
    %c0_i32_1 = arith.constant 0 : i32
    return %arg0, %c0_i32, %c0_i32_0 : i32, i32, i32
  }
  func.func @transform_1(%arg0: i32) -> (i32, i32) {
    %c0_i32 = arith.constant 0 : i32
    %c0_i32_0 = arith.constant 0 : i32
    %c0_i32_1 = arith.constant 0 : i32
    return %c0_i32, %c0_i32_0 : i32, i32
  }
  func.func @transform_2(%arg0: i32) -> (i32, i32) {
    %c0_i32 = arith.constant 0 : i32
    %c0_i32_0 = arith.constant 0 : i32
    %c0_i32_1 = arith.constant 0 : i32
    return %c0_i32, %c0_i32_0 : i32, i32
  }
  func.func @transform_3(%arg0: i32) -> (i32, i32) {
    %c0_i32 = arith.constant 0 : i32
    %c0_i32_0 = arith.constant 0 : i32
    %c0_i32_1 = arith.constant 0 : i32
    return %c0_i32, %c0_i32_0 : i32, i32
  }
  func.func @transform_4(%arg0: i32) -> (i32, i32) {
    %c0_i32 = arith.constant 0 : i32
    %c0_i32_0 = arith.constant 0 : i32
    %c0_i32_1 = arith.constant 0 : i32
    return %c0_i32, %c0_i32_0 : i32, i32
  }
  func.func @transform_5(%arg0: i32) -> (i32, i32) {
    %c0_i32 = arith.constant 0 : i32
    %c0_i32_0 = arith.constant 0 : i32
    %c0_i32_1 = arith.constant 0 : i32
    return %c0_i32, %c0_i32_0 : i32, i32
  }
  func.func @transform_6(%arg0: i32) -> (i32, i32) {
    %c0_i32 = arith.constant 0 : i32
    %c0_i32_0 = arith.constant 0 : i32
    %c0_i32_1 = arith.constant 0 : i32
    return %c0_i32, %c0_i32_0 : i32, i32
  }
  func.func @transform_7(%arg0: i32) -> (i32, i32) {
    %c0_i32 = arith.constant 0 : i32
    %c0_i32_0 = arith.constant 0 : i32
    %c0_i32_1 = arith.constant 0 : i32
    return %c0_i32, %c0_i32_0 : i32, i32
  }
  func.func @transform_8(%arg0: i32) -> (i32, i32) {
    %c0_i32 = arith.constant 0 : i32
    %c0_i32_0 = arith.constant 0 : i32
    %c0_i32_1 = arith.constant 0 : i32
    return %c0_i32, %c0_i32_0 : i32, i32
  }
  func.func @transform_9(%arg0: i32) -> (i32, i32) {
    %c0_i32 = arith.constant 0 : i32
    %c0_i32_0 = arith.constant 0 : i32
    %c0_i32_1 = arith.constant 0 : i32
    return %c0_i32, %c0_i32_0 : i32, i32
  }
  func.func @transform_10(%arg0: i32) -> (i32, i32, i32) {
    %c0_i32 = arith.constant 0 : i32
    %c0_i32_0 = arith.constant 0 : i32
    %c0_i32_1 = arith.constant 0 : i32
    return %arg0, %c0_i32, %c0_i32_0 : i32, i32, i32
  }
  func.func @transform_11(%arg0: i32) -> (i32, i32, i32) {
    %c0_i32 = arith.constant 0 : i32
    %c0_i32_0 = arith.constant 0 : i32
    %c0_i32_1 = arith.constant 0 : i32
    return %arg0, %c0_i32, %c0_i32_0 : i32, i32, i32
  }
}

</mosaic_0001>

<bundles_post_ra>
// kernel: pointnet_encoder_forward.1
= control target key start
LH: loop header
LB: loop body
LE: loop exit
PB: predicated region body
PF: predicated region fallthrough
CT: control target
= control target key end

     0   :  { %17 = vsyncpa [#allocation3], 0  ;;  %s2494_s0 = inlined_call_operand.vmem [shape: f32[4,64,3], index: 0, kind: input, shape index: {}]   ;;  %s2495_s1 = inlined_call_operand.vmem [shape: f32[3,32], index: 1, kind: input, shape index: {}]   ;;  %s2496_s2 = inlined_call_operand.vmem [shape: f32[1,32], index: 2, kind: input, shape index: {}]   ;;  %s2497_s3 = inlined_call_operand.vmem [shape: f32[32,32], index: 3, kind: input, shape index: {}]   ;;  %s2498_s4 = inlined_call_operand.vmem [shape: f32[1,32], index: 4, kind: input, shape index: {}]   ;;  %s2499_s5 = inlined_call_operand.vmem [shape: f32[32,32], index: 5, kind: input, shape index: {}]   ;;  %s2500_s6 = inlined_call_operand.vmem [shape: f32[32,32], index: 6, kind: input, shape index: {}]   ;;  %s2501_s7 = inlined_call_operand.vmem [shape: f32[1,32], index: 7, kind: input, shape index: {}]   ;;  %s2502_s8 = inlined_call_operand.vmem [shape: f32[32,32], index: 8, kind: input, shape index: {}]   ;;  %s2503_s9 = inlined_call_operand.vmem [shape: f32[1,32], index: 9, kind: input, shape index: {}]   ;;  %s2504_s10 = inlined_call_operand.hbm [shape: f32[4,1,32], index: 10, kind: output, shape index: {0}]   ;;  %s2505_s11 = inlined_call_operand.vmem [shape: f32[4,64,32], index: 11, kind: output, shape index: {1}]  }
   0x1   :  { %19 = vsyncpa [#allocation3 + $0x1], 0  ;;  %s2128_s17 = smov 0   ;;  %s2130_s18 = smov 0  }
   0x2   :  { %s2132_s19 = smov 0   ;;  %s2134_s20 = smov 0  }
   0x3 LB: > { %s2149_s21 = sadd.s32 4294967295, %s2059_s20   ;;  %s1618_s22 = sadd.s32 4294967294, %s2059_s20   ;;  %s2059_s20 = sphi %s2134_s20, %s2513_s20   ;;  %s2055_s19 = sphi %s2132_s19, %s2512_s19   ;;  %s2051_s18 = sphi %s2130_s18, %s2511_s18   ;;  %s2047_s17 = sphi %s2128_s17, %s2510_s17  }
   0x4   : > { %s2153_s23 = sadd.s32 1, %s2059_s20   ;;  %s247_s24 = sadd.s32 1, %s2055_s19 }
   0x5   : > { %s244_s25 = ssub.s32 %s2059_s20, %s2153_s23  ;;  %p257_p0 = scmp.ne.s32.totalorder %s2055_s19, %s2051_s18 }
   0x6   : > { %p245_p1 = scmp.eq.s32.totalorder %s244_s25, 0  ;;  %p258_p2 = scmp.eq.s32.totalorder %s2149_s21, 1 }
   0x7   : > { %p263_p3 = scmp.ne.s32.totalorder %s2051_s18, %s2047_s17  ;;  %p264_p4 = scmp.eq.s32.totalorder %s1618_s22, 1 }
   0x8   : > { %s2164_s26 = scalar_select %p245_p1, %s2055_s19, %s247_s24  }
   0x9   : > { %p2166_p5 = por %p258_p2, %p257_p0  ;;  %p2170_p6 = por %p264_p4, %p263_p3 }
   0xa   : > { %p1621_p7 = scmp.ge.s32.totalorder %s2059_s20, 1  ;;  %p345_p8 = scmp.lt.s32.totalorder %s2059_s20, 3 }
   0xc   : > { %p346_p9 = pnand %p1621_p7, %p345_p8 }
   0xd   : > { %v423_v0 = vld [vmem:[%s2495_s1] sm:$0x7] (!%p346_p9)  ;;  %vm480_vm0 = vcmask (!%p346_p9), 1042432   ;;  %s1623_s12 = sshll.u32 (!%p346_p9), %s2149_s21, 1  ;;  %v646_v2 = vld [vmem:[%s2497_s3 + $0x8] sm:$0xff] (!%p346_p9)  ;;  %vm431_vm1 = vcmask (!%p346_p9), 23552  }
   0xe   : > { %349 = sbr.rel (%p346_p9) target bundleno = 1005 (0x3ed), region = 60  ;;  %v645_v1 = vld [vmem:[%s2497_s3] sm:$0xff] (!%p346_p9)  ;;  %1789 = vmatprep.subr.msk.mxu0 (!%p346_p9), %vm480_vm0, %v423_v0  ;;  %p393_p10 = scmp.lt.s32.totalorder (!%p346_p9), %s1623_s12, 3  ;;  %v647_v20 = vld [vmem:[%s2497_s3 + $0x10] sm:$0xff] (!%p346_p9)  ;;  %v648_v21 = vld [vmem:[%s2497_s3 + $0x18] sm:$0xff] (!%p346_p9)  ;;  %vm656_vm2 = vcmask (!%p346_p9), 261120  }
   0xf   : > { %1790 = vmatpush3.msk.msra.mxu0 (!%p346_p9), %vm480_vm0, %v423_v0  ;;  %v1922_v3 = vpack.c.bf16 (!%p346_p9), %v646_v2, %v645_v1  ;;  %v1926_v22 = vpack.c.bf16 (!%p346_p9), %v648_v21, %v647_v20  ;;  %v979_v23 = vld [vmem:[%s2499_s5] sm:$0xff] (!%p346_p9)  ;;  %v980_v24 = vld [vmem:[%s2499_s5 + $0x8] sm:$0xff] (!%p346_p9)  ;;  %vm2062_vm3 = vmmov (!%p346_p9), 0   ;;  %v2063_v21 = vmov (!%p346_p9), 0.0   ;;  %s1706_s24 = sshll.u32 (!%p346_p9), %s2149_s21, 5  ;;  %s2065_s21 = smov (!%p346_p9), [#allocation2]  }
  0x10   : > { %v1936_v25 = vpack.c.bf16 (!%p346_p9), %v980_v24, %v979_v23  ;;  %v1629_v26 = vld [vmem:[%s2496_s2] ss:$0 sm:$0xff] (!%p346_p9)  ;;  %vm905_vm4 = vcmask (!%p346_p9), 1041409   ;;  %vm1503_vm5 = vcmask (!%p346_p9), 253952  }
  0x11   : > { %1923 = vmatprep.subr.bf16.mxu1 (!%p346_p9), %v1922_v3 }
  0x12   : > { %1925 = vmatpush3.bf16.msra.mxu1 (!%p346_p9), %v1922_v3 }
  0x13   : > { %1927 = vmatprep.subr.bf16.mxu1 (!%p346_p9), %v1926_v22 }
  0x15   : > { %s2515_s12 = smov (!%p393_p10, %s1623_s12), 3 }
  0x16   : > { %s2506_s22 = sshll.u32 %s2515_s12, 6  ;;  %1929 = vmatpush3.bf16.msra.mxu1 %v1926_v22  ;;  %v2280_v22 = vld [vmem:[%s2498_s4] ss:$0 sm:$0xff]  ;;  %s2509_s30 = sshll.u32 %s2515_s12, 6 }
  0x17   : > { %s2194_s29 = scalar_lea.vmem %s2494_s0, %s2506_s22  ;;  %1937 = vmatprep.subr.bf16.mxu1 %v1936_v25  ;;  %s2372_s14 = scalar_lea.vmem %s2505_s11, %s2509_s30 }
  0x18   : > { %v407_v4 = vld [vmem:[%s2194_s29] sm:$0xff]  ;;  %v408_v5 = vld [vmem:[%s2194_s29 + $0x8] sm:$0xff]  ;;  %v409_v6 = vld [vmem:[%s2194_s29 + $0x10] sm:$0xff]  ;;  %s381_s12 = sand.u32 1, %s2051_s18   ;;  %s2446_s22 = scalar_lea.hbm %s2504_s10, %s1706_s24 }
  0x19   : > { %1791 = vmatprep.mubr.msk.f32.mxu0 %vm431_vm1, %v407_v4  ;;  %v410_v7 = vld [vmem:[%s2194_s29 + $0x18] sm:$0xff]  ;;  %v411_v8 = vld [vmem:[%s2194_s29 + $0x20] sm:$0xff]  ;;  %v412_v9 = vld [vmem:[%s2194_s29 + $0x28] sm:$0xff]  ;;  %s1622_s15 = sshll.u32 %s381_s12, 1  ;;  %s2453_s13 = scalar_lea.sflag [#allocation3], %s381_s12 }
  0x1a   : > { %1792 = vmatmul.mubr.msk.f32.vlgmr.msra.gmra.mrb[0].mxu0 %vm431_vm1, %v408_v5  ;;  %v413_v10 = vld [vmem:[%s2194_s29 + $0x30] sm:$0xff]  ;;  %v414_v11 = vld [vmem:[%s2194_s29 + $0x38] sm:$0xff]  ;;  %v415_v12 = vld [vmem:[%s2194_s29 + $0x40] sm:$0xff]  ;;  %s383_s16 = scalar_lea.vmem [#allocation2], %s1622_s15  ;;  %s2001_s15 = sshll.u32 %s2065_s21, 4  ;;  %s2002_s15 = int_to_ptr.vmem [resolvable:$false] %s2001_s15 }
  0x1b   : > { %1794 = vmatprep.mubr.msk.f32.mxu0 %vm431_vm1, %v409_v6  ;;  %v416_v13 = vld [vmem:[%s2194_s29 + $0x48] sm:$0xff]  ;;  %v417_v14 = vld [vmem:[%s2194_s29 + $0x50] sm:$0xff]  ;;  %v418_v15 = vld [vmem:[%s2194_s29 + $0x58] sm:$0xff]  ;;  %s1526_s25 = sshll.u32 %s383_s16, 4  ;;  %s2003_s24 = scalar_lea.vmem %s2002_s15, 64  ;;  %s2448_s25 = int_to_ptr.vmem [resolvable:$true] %s1526_s25 }
  0x1c   : > { %v419_v16 = vld [vmem:[%s2194_s29 + $0x60] sm:$0xff]  ;;  %v420_v17 = vld [vmem:[%s2194_s29 + $0x68] sm:$0xff]  ;;  %v421_v18 = vld [vmem:[%s2194_s29 + $0x70] sm:$0xff]  ;;  %p2004_p0 = scmp.lt.s32.totalorder %s2448_s25, %s2002_s15 }
  0x1d   : > { %v422_v19 = vld [vmem:[%s2194_s29 + $0x78] sm:$0xff] }
  0x1e   : > { %1795 = vmatmul.mubr.msk.f32.gmra.mrb[2].mxu0 %vm431_vm1, %v410_v7 }
  0x1f   : > { %1797 = vmatprep.mubr.msk.f32.mxu0 %vm431_vm1, %v411_v8 }
  0x22   : > { %1798 = vmatmul.mubr.msk.f32.gmra.mrb[4].mxu0 %vm431_vm1, %v412_v9 }
  0x23   : > { %1800 = vmatprep.mubr.msk.f32.mxu0 %vm431_vm1, %v413_v10 }
  0x26   : > { %1801 = vmatmul.mubr.msk.f32.gmra.mrb[6].mxu0 %vm431_vm1, %v414_v11  ;;  %v981_v11 = vld [vmem:[%s2499_s5 + $0x10] sm:$0xff] }
  0x27   : > { %1803 = vmatprep.mubr.msk.f32.mxu0 %vm431_vm1, %v415_v12  ;;  %v982_v12 = vld [vmem:[%s2499_s5 + $0x18] sm:$0xff] }
  0x2a   : > { %1804 = vmatmul.mubr.msk.f32.gmra.mrb[8].mxu0 %vm431_vm1, %v416_v13  ;;  %v1940_v13 = vpack.c.bf16 %v982_v12, %v981_v11 }
  0x2b   : > { %1806 = vmatprep.mubr.msk.f32.mxu0 %vm431_vm1, %v417_v14  ;;  %v892_v14 = vld [vmem:[%s2500_s6] sm:$0xff] }
  0x2e   : > { %1807 = vmatmul.mubr.msk.f32.gmra.mrb[10].mxu0 %vm431_vm1, %v418_v15  ;;  %v893_v15 = vld [vmem:[%s2500_s6 + $0x8] sm:$0xff] }
  0x2f   : > { %1809 = vmatprep.mubr.msk.f32.mxu0 %vm431_vm1, %v419_v16  ;;  %v2061_v16 = vmov 0.0|0.0  }
  0x30   : > { %1930 = vmatprep.subr.bf16.mxu0 %v2061_v16 }
  0x32   : > { %1810 = vmatmul.mubr.msk.f32.gmra.mrb[12].mxu0 %vm431_vm1, %v420_v17  ;;  %v1931_v17 = vpack.c.bf16 %v893_v15, %v892_v14 }
  0x33   : > { %1812 = vmatprep.mubr.msk.f32.mxu0 %vm431_vm1, %v421_v18  ;;  %v894_v18 = vld [vmem:[%s2500_s6 + $0x10] sm:$0xff] }
  0x34   : > { %1932 = vmatpush3.bf16.msra.mxu0 %v1931_v17 }
  0x35   : > { %1933 = vmatprep.subr.bf16.mxu0 %v2061_v16 }
  0x36   : > { %1813 = vmatmul.mubr.msk.f32.gmra.mrb[14].mxu0 %vm431_vm1, %v422_v19  ;;  %v895_v19 = vld [vmem:[%s2500_s6 + $0x18] sm:$0xff] }
  0x37   : > { %v1934_v20 = vpack.c.bf16 %v895_v19, %v894_v18  ;;  %1855 = vmatprep.mubr.msk.f32.mxu0 %vm2062_vm3, %v2063_v21 }
  0x39   : > { %1935 = vmatpush3.bf16.msra.mxu0 %v1934_v20 }
  0xed   : > { %v1793_v27 = vpop.f32.mrb[0].mxu0 }
  0xee   : > { %v556_v28 = vadd.f32 %v1793_v27, %v1629_v26  ;;  %v550_v29 = vpop.f32.mrb[1].mxu0 }
  0xef   : > { %v551_v30 = vadd.f32 %v1629_v26, %v550_v29 }
  0xf0   : > { %v630_v33 = vmax.f32 %v556_v28, 0.0 }
  0xf1   : > { %v629_v31 = vmax.f32 %v551_v30, 0.0  ;;  %v1796_v32 = vpop.f32.mrb[2].mxu0 }
  0xf2   : > { %v566_v34 = vadd.f32 %v1796_v32, %v1629_v26  ;;  %v560_v35 = vpop.f32.mrb[3].mxu0 }
  0xf3   : > { %v561_v36 = vadd.f32 %v1629_v26, %v560_v35  ;;  %1823 = vmatprep.mubr.msk.f32.mxu1 %vm656_vm2, %v629_v31 }
  0xf4   : > { %1824 = vmatmul.mubr.msk.f32.vlgmr.msra.gmra.mrb[0].mxu1 %vm656_vm2, %v630_v33  ;;  %v632_v39 = vmax.f32 %v566_v34, 0.0 }
  0xf5   : > { %v631_v37 = vmax.f32 %v561_v36, 0.0  ;;  %v1799_v38 = vpop.f32.mrb[4].mxu0  ;;  %1939 = vmatpush3.bf16.msra.mxu1 %v1936_v25 }
  0xf6   : > { %v576_v40 = vadd.f32 %v1799_v38, %v1629_v26  ;;  %v570_v41 = vpop.f32.mrb[5].mxu0  ;;  %1941 = vmatprep.subr.bf16.mxu1 %v1940_v13 }
  0xf7   : > { %v571_v42 = vadd.f32 %v1629_v26, %v570_v41  ;;  %1826 = vmatprep.mubr.msk.f32.mxu1 %vm656_vm2, %v631_v37 }
  0xf8   : > { %1827 = vmatmul.mubr.msk.f32.gmra.mrb[2].mxu1 %vm656_vm2, %v632_v39  ;;  %v634_v45 = vmax.f32 %v576_v40, 0.0 }
  0xf9   : > { %v633_v43 = vmax.f32 %v571_v42, 0.0  ;;  %v1802_v44 = vpop.f32.mrb[6].mxu0  ;;  %1943 = vmatpush3.bf16.msra.mxu1 %v1940_v13 }
  0xfa   : > { %v586_v46 = vadd.f32 %v1802_v44, %v1629_v26  ;;  %v580_v47 = vpop.f32.mrb[7].mxu0 }
  0xfb   : > { %v581_v48 = vadd.f32 %v1629_v26, %v580_v47  ;;  %1829 = vmatprep.mubr.msk.f32.mxu1 %vm656_vm2, %v633_v43 }
  0xfc   : > { %1830 = vmatmul.mubr.msk.f32.gmra.mrb[4].mxu1 %vm656_vm2, %v634_v45  ;;  %v636_v51 = vmax.f32 %v586_v46, 0.0 }
  0xfd   : > { %v635_v49 = vmax.f32 %v581_v48, 0.0  ;;  %v1805_v50 = vpop.f32.mrb[8].mxu0 }
  0xfe   : > { %v596_v52 = vadd.f32 %v1805_v50, %v1629_v26  ;;  %v590_v53 = vpop.f32.mrb[9].mxu0 }
  0xff   : > { %v591_v54 = vadd.f32 %v1629_v26, %v590_v53  ;;  %1832 = vmatprep.mubr.msk.f32.mxu1 %vm656_vm2, %v635_v49 }
 0x100   : > { %1833 = vmatmul.mubr.msk.f32.gmra.mrb[6].mxu1 %vm656_vm2, %v636_v51  ;;  %v638_v57 = vmax.f32 %v596_v52, 0.0 }
 0x101   : > { %v637_v55 = vmax.f32 %v591_v54, 0.0  ;;  %v1808_v56 = vpop.f32.mrb[10].mxu0 }
 0x102   : > { %v606_v58 = vadd.f32 %v1808_v56, %v1629_v26  ;;  %v600_v59 = vpop.f32.mrb[11].mxu0 }
 0x103   : > { %v601_v60 = vadd.f32 %v1629_v26, %v600_v59  ;;  %1835 = vmatprep.mubr.msk.f32.mxu1 %vm656_vm2, %v637_v55 }
 0x104   : > { %1836 = vmatmul.mubr.msk.f32.gmra.mrb[8].mxu1 %vm656_vm2, %v638_v57  ;;  %v640_v63 = vmax.f32 %v606_v58, 0.0 }
 0x105   : > { %v639_v61 = vmax.f32 %v601_v60, 0.0  ;;  %v1811_v62 = vpop.f32.mrb[12].mxu0 }
 0x106   : > { %v616_v0 = vadd.f32 %v1811_v62, %v1629_v26  ;;  %v610_v1 = vpop.f32.mrb[13].mxu0 }
 0x107   : > { %v611_v2 = vadd.f32 %v1629_v26, %v610_v1  ;;  %1838 = vmatprep.mubr.msk.f32.mxu1 %vm656_vm2, %v639_v61 }
 0x108   : > { %1839 = vmatmul.mubr.msk.f32.gmra.mrb[10].mxu1 %vm656_vm2, %v640_v63  ;;  %v642_v5 = vmax.f32 %v616_v0, 0.0 }
 0x109   : > { %v641_v3 = vmax.f32 %v611_v2, 0.0  ;;  %v1814_v4 = vpop.f32.mrb[14].mxu0 }
 0x10a   : > { %v626_v6 = vadd.f32 %v1814_v4, %v1629_v26  ;;  %v620_v7 = vpop.f32.mrb[15].mxu0 }
 0x10b   : > { %v621_v8 = vadd.f32 %v1629_v26, %v620_v7  ;;  %1841 = vmatprep.mubr.msk.f32.mxu1 %vm656_vm2, %v641_v3 }
 0x10c   : > { %1842 = vmatmul.mubr.msk.f32.gmra.mrb[12].mxu1 %vm656_vm2, %v642_v5  ;;  %v644_v10 = vmax.f32 %v626_v6, 0.0 }
 0x10d   : > { %v643_v9 = vmax.f32 %v621_v8, 0.0 }
 0x10f   : > { %1844 = vmatprep.mubr.msk.f32.mxu1 %vm656_vm2, %v643_v9 }
 0x110   : > { %1845 = vmatmul.mubr.msk.f32.gmra.mrb[14].mxu1 %vm656_vm2, %v644_v10 }
 0x1c7   : > { %v1825_v23 = vpop.f32.mrb[0].mxu1 }
 0x1c8   : > { %v771_v24 = vpop.f32.mrb[1].mxu1  ;;  %v777_v26 = vadd.f32 %v1825_v23, %v2280_v22 }
 0x1c9   : > { %v772_v25 = vadd.f32 %v2280_v22, %v771_v24 }
 0x1ca   : > { %v851_v31 = vsel %vm656_vm2, %v777_v26, -inf }
 0x1cb   : > { %v1828_v27 = vpop.f32.mrb[2].mxu1  ;;  %1866 = vmatprep.mubr.msk.f32.mxu1 %vm656_vm2, %v772_v25  ;;  %v850_v33 = vsel %vm656_vm2, %v772_v25, -inf }
 0x1cc   : > { %v787_v28 = vadd.f32 %v1828_v27, %v2280_v22  ;;  %v781_v29 = vpop.f32.mrb[3].mxu1  ;;  %1867 = vmatmul.mubr.msk.f32.vlgmr.msra.gmra.mrb[16].mxu1 %vm656_vm2, %v777_v26 }
 0x1cd   : > { %v782_v30 = vadd.f32 %v2280_v22, %v781_v29 }
 0x1ce   : > { %v854_v32 = vsel %vm656_vm2, %v787_v28, -inf }
 0x1cf   : > { %v855_v34 = vmax.f32 %v851_v31, %v854_v32  ;;  %v852_v35 = vsel %vm656_vm2, %v782_v30, -inf  ;;  %v1831_v36 = vpop.f32.mrb[4].mxu1  ;;  %1869 = vmatprep.mubr.msk.f32.mxu1 %vm656_vm2, %v782_v30 }
 0x1d0   : > { %v853_v37 = vmax.f32 %v850_v33, %v852_v35  ;;  %v797_v38 = vadd.f32 %v1831_v36, %v2280_v22  ;;  %v791_v39 = vpop.f32.mrb[5].mxu1  ;;  %1870 = vmatmul.mubr.msk.f32.gmra.mrb[18].mxu1 %vm656_vm2, %v787_v28  ;;  %v1242_v35 = vld [vmem:[%s2502_s8 + $0x8] sm:$0xff] }
 0x1d1   : > { %v792_v40 = vadd.f32 %v2280_v22, %v791_v39 }
 0x1d2   : > { %v858_v41 = vsel %vm656_vm2, %v797_v38, -inf }
 0x1d3   : > { %v859_v42 = vmax.f32 %v855_v34, %v858_v41  ;;  %v856_v43 = vsel %vm656_vm2, %v792_v40, -inf  ;;  %v1834_v44 = vpop.f32.mrb[6].mxu1  ;;  %1872 = vmatprep.mubr.msk.f32.mxu1 %vm656_vm2, %v792_v40  ;;  %v1241_v34 = vld [vmem:[%s2502_s8] sm:$0xff] }
 0x1d4   : > { %v857_v45 = vmax.f32 %v853_v37, %v856_v43  ;;  %v807_v46 = vadd.f32 %v1834_v44, %v2280_v22  ;;  %v801_v47 = vpop.f32.mrb[7].mxu1  ;;  %1873 = vmatmul.mubr.msk.f32.gmra.mrb[20].mxu1 %vm656_vm2, %v797_v38  ;;  %v1944_v36 = vpack.c.bf16 %v1242_v35, %v1241_v34  ;;  %v1243_v37 = vld [vmem:[%s2502_s8 + $0x10] sm:$0xff]  ;;  %v1244_v38 = vld [vmem:[%s2502_s8 + $0x18] sm:$0xff] }
 0x1d5   : > { %v802_v48 = vadd.f32 %v2280_v22, %v801_v47  ;;  %v1948_v39 = vpack.c.bf16 %v1244_v38, %v1243_v37 }
 0x1d6   : > { %v862_v49 = vsel %vm656_vm2, %v807_v46, -inf  ;;  %1945 = vmatprep.subr.bf16.mxu0 %v1944_v36 }
 0x1d7   : > { %v863_v50 = vmax.f32 %v859_v42, %v862_v49  ;;  %v860_v51 = vsel %vm656_vm2, %v802_v48, -inf  ;;  %v1837_v52 = vpop.f32.mrb[8].mxu1  ;;  %1875 = vmatprep.mubr.msk.f32.mxu1 %vm656_vm2, %v802_v48 }
 0x1d8   : > { %v861_v53 = vmax.f32 %v857_v45, %v860_v51  ;;  %v811_v54 = vpop.f32.mrb[9].mxu1  ;;  %1876 = vmatmul.mubr.msk.f32.gmra.mrb[22].mxu1 %vm656_vm2, %v807_v46  ;;  %v817_v57 = vadd.f32 %v1837_v52, %v2280_v22 }
 0x1d9   : > { %v812_v55 = vadd.f32 %v2280_v22, %v811_v54 }
 0x1da   : > { %v864_v56 = vmax.f32 %v861_v53, %v863_v50  ;;  %v872_v62 = vsel %vm656_vm2, %v817_v57, -inf }
 0x1db   : > { %v1840_v58 = vpop.f32.mrb[10].mxu1  ;;  %1878 = vmatprep.mubr.msk.f32.mxu1 %vm656_vm2, %v812_v55  ;;  %v871_v0 = vsel %vm656_vm2, %v812_v55, -inf }
 0x1dc   : > { %v827_v59 = vadd.f32 %v1840_v58, %v2280_v22  ;;  %v821_v60 = vpop.f32.mrb[11].mxu1  ;;  %1879 = vmatmul.mubr.msk.f32.gmra.mrb[24].mxu1 %vm656_vm2, %v817_v57  ;;  %v865_v8 = vrot.slane %v864_v56, 4  ;;  %v1180_v58 = vlaneseq }
 0x1dd   : > { %v822_v61 = vadd.f32 %v2280_v22, %v821_v60 }
 0x1de   : > { %v875_v63 = vsel %vm656_vm2, %v827_v59, -inf  ;;  %v866_v17 = vmax.f32 %v864_v56, %v865_v8  ;;  %v2064_v56 = vmov 1966171168   ;;  %v1181_v60 = vshrl.u32 %v1180_v58, 7 }
 0x1df   : > { %v876_v1 = vmax.f32 %v872_v62, %v875_v63  ;;  %v873_v2 = vsel %vm656_vm2, %v822_v61, -inf  ;;  %v1843_v3 = vpop.f32.mrb[12].mxu1  ;;  %1881 = vmatprep.mubr.msk.f32.mxu1 %vm656_vm2, %v822_v61  ;;  %v1178_v57 = vunpack.c.l.s4 %v2064_v56  ;;  %v1664_v61 = vld [vmem:[%s2501_s7] ss:$0 sm:$0xff] }
 0x1e0   : > { %v874_v4 = vmax.f32 %v871_v0, %v873_v2  ;;  %v837_v5 = vadd.f32 %v1843_v3, %v2280_v22  ;;  %v831_v6 = vpop.f32.mrb[13].mxu1  ;;  %1882 = vmatmul.mubr.msk.f32.gmra.mrb[26].mxu1 %vm656_vm2, %v827_v59  ;;  %v867_v23 = vrot.slane %v866_v17, 2  ;;  %v1201_v3 = vsub.s32 0, %v1181_v60 }
 0x1e1   : > { %v832_v7 = vadd.f32 %v2280_v22, %v831_v6  ;;  %v1179_v59 = vunpack.c.0.s8 %v1178_v57 }
 0x1e2   : > { %v879_v9 = vsel %vm656_vm2, %v837_v5, -inf  ;;  %v868_v26 = vmax.f32 %v866_v17, %v867_v23 }
 0x1e3   : > { %v880_v10 = vmax.f32 %v876_v1, %v879_v9  ;;  %v877_v11 = vsel %vm656_vm2, %v832_v7, -inf  ;;  %v1846_v12 = vpop.f32.mrb[14].mxu1  ;;  %1884 = vmatprep.mubr.msk.f32.mxu1 %vm656_vm2, %v832_v7  ;;  %v1182_v62 = vsub.s32 %v1179_v59, %v1181_v60 }
 0x1e4   : > { %v878_v13 = vmax.f32 %v874_v4, %v877_v11  ;;  %v847_v14 = vadd.f32 %v1846_v12, %v2280_v22  ;;  %v841_v15 = vpop.f32.mrb[15].mxu1  ;;  %1885 = vmatmul.mubr.msk.f32.gmra.mrb[28].mxu1 %vm656_vm2, %v837_v5  ;;  %v869_v29 = vrot.slane %v868_v26, 1 }
 0x1e5   : > { %v842_v16 = vadd.f32 %v2280_v22, %v841_v15 }
 0x1e6   : > { %v883_v18 = vsel %vm656_vm2, %v847_v14, -inf  ;;  %v870_v31 = vmax.f32 %v868_v26, %v869_v29 }
 0x1e7   : > { %v884_v19 = vmax.f32 %v880_v10, %v883_v18  ;;  %v881_v20 = vsel %vm656_vm2, %v842_v16, -inf  ;;  %1887 = vmatprep.mubr.msk.f32.mxu1 %vm656_vm2, %v842_v16 }
 0x1e8   : > { %v882_v21 = vmax.f32 %v878_v13, %v881_v20  ;;  %1888 = vmatmul.mubr.msk.f32.gmra.mrb[30].mxu1 %vm656_vm2, %v847_v14 }
 0x1ea   : > { %v885_v24 = vmax.f32 %v882_v21, %v884_v19 }
 0x1ec   : > { %v886_v25 = vrot.slane %v885_v24, 4 }
 0x1ee   : > { %v887_v27 = vmax.f32 %v885_v24, %v886_v25 }
 0x1f0   : > { %v888_v28 = vrot.slane %v887_v27, 2 }
 0x1f2   : > { %v889_v30 = vmax.f32 %v887_v27, %v888_v28 }
 0x1f4   : > { %v890_v22 = vrot.slane %v889_v30, 1 }
 0x1f6   : > { %v891_v32 = vmax.f32 %v889_v30, %v890_v22 }
 0x1f8   : > { %v906_v33 = vsel %vm905_vm4, %v891_v32, %v870_v31 }
 0x1f9   : > { %1856 = vmatmul.mubr.msk.f32.vlgmr.msra.gmra.mrb[16].mxu0 %vm656_vm2, %v906_v33 }
 0x1fa   : > { %1947 = vmatpush3.bf16.msra.mxu0 %v1944_v36 }
 0x1fb   : > { %1949 = vmatprep.subr.bf16.mxu0 %v1948_v39 }
 0x1fe   : > { %1951 = vmatpush3.bf16.msra.mxu0 %v1948_v39 }
 0x29f   : > { %v1868_v40 = vpop.f32.mrb[16].mxu1 }
 0x2a0   : > { %v1097_v41 = vpop.f32.mrb[17].mxu1 }
 0x2a3   : > { %v1871_v42 = vpop.f32.mrb[18].mxu1 }
 0x2a4   : > { %v1107_v43 = vpop.f32.mrb[19].mxu1 }
 0x2a7   : > { %v1874_v44 = vpop.f32.mrb[20].mxu1 }
 0x2a8   : > { %v1117_v45 = vpop.f32.mrb[21].mxu1 }
 0x2ab   : > { %v1877_v46 = vpop.f32.mrb[22].mxu1 }
 0x2ac   : > { %v1127_v47 = vpop.f32.mrb[23].mxu1 }
 0x2af   : > { %v1880_v48 = vpop.f32.mrb[24].mxu1 }
 0x2b0   : > { %v1137_v49 = vpop.f32.mrb[25].mxu1 }
 0x2b3   : > { %v1883_v50 = vpop.f32.mrb[26].mxu1 }
 0x2b4   : > { %v1147_v51 = vpop.f32.mrb[27].mxu1 }
 0x2b7   : > { %v1886_v52 = vpop.f32.mrb[28].mxu1 }
 0x2b8   : > { %v1157_v53 = vpop.f32.mrb[29].mxu1 }
 0x2bb   : > { %v1889_v54 = vpop.f32.mrb[30].mxu1 }
 0x2bc   : > { %v1167_v55 = vpop.f32.mrb[31].mxu1 }
 0x2cc   : > { %v975_v63 = vpop.f32.mrb[16].mxu0 }
 0x2cd   : > { %v976_v0 = vadd.f32 %v1664_v61, %v975_v63  ;;  %v1857_v1 = vpop.f32.mrb[17].mxu0 }
 0x2cf   : > { %v1183_v2 = vrot.slane %v976_v0, %v1182_v62 }
 0x2d1   : > { %v1184_v4 = vcombine.high %v1183_v2, %v1183_v2  ;;  %v1191_v5 = vrot.slane %v1183_v2, %v1182_v62 }
 0x2d3   : > { %v1198_v6 = vrot.slane %v1184_v4, %v1182_v62  ;;  %v1202_v7 = vrot.slane %v1191_v5, %v1201_v3 }
 0x2d5   : > { %v1206_v8 = vrot.slane %v1198_v6, %v1201_v3  ;;  %v1209_v9 = vadd.f32 %v1202_v7, %v1097_v41  ;;  %v1210_v10 = vadd.f32 %v1868_v40, %v1202_v7  ;;  %v1211_v11 = vadd.f32 %v1202_v7, %v1107_v43  ;;  %v2365_v41 = vld [vmem:[%s2503_s9] ss:$0 sm:$0xff] }
 0x2d6   : > { %v1212_v12 = vadd.f32 %v1871_v42, %v1202_v7  ;;  %v1213_v13 = vadd.f32 %v1202_v7, %v1117_v45  ;;  %v1214_v14 = vadd.f32 %v1874_v44, %v1202_v7  ;;  %v1215_v15 = vadd.f32 %v1202_v7, %v1127_v47 }
 0x2d7   : > { %v1225_v16 = vmax.f32 %v1209_v9, 0.0  ;;  %v1226_v17 = vmax.f32 %v1210_v10, 0.0  ;;  %v1216_v18 = vadd.f32 %v1877_v46, %v1202_v7  ;;  %v1227_v19 = vmax.f32 %v1211_v11, 0.0 }
 0x2d8   : > { %v1217_v20 = vadd.f32 %v1206_v8, %v1137_v49  ;;  %v1218_v21 = vadd.f32 %v1880_v48, %v1206_v8  ;;  %v1219_v23 = vadd.f32 %v1206_v8, %v1147_v51  ;;  %v1220_v24 = vadd.f32 %v1883_v50, %v1206_v8 }
 0x2d9   : > { %1898 = vmatprep.mubr.msk.f32.mxu0 %vm656_vm2, %v1225_v16  ;;  %v1221_v25 = vadd.f32 %v1206_v8, %v1157_v53  ;;  %v1222_v26 = vadd.f32 %v1886_v52, %v1206_v8  ;;  %v1223_v27 = vadd.f32 %v1206_v8, %v1167_v55  ;;  %v1224_v28 = vadd.f32 %v1889_v54, %v1206_v8 }
 0x2da   : > { %1899 = vmatmul.mubr.msk.f32.vlgmr.msra.gmra.mrb[18].mxu0 %vm656_vm2, %v1226_v17  ;;  %v1228_v29 = vmax.f32 %v1212_v12, 0.0  ;;  %v1229_v30 = vmax.f32 %v1213_v13, 0.0  ;;  %v1230_v22 = vmax.f32 %v1214_v14, 0.0  ;;  %v1231_v31 = vmax.f32 %v1215_v15, 0.0 }
 0x2db   : > { %1901 = vmatprep.mubr.msk.f32.mxu0 %vm656_vm2, %v1227_v19  ;;  %v1232_v32 = vmax.f32 %v1216_v18, 0.0  ;;  %v1233_v33 = vmax.f32 %v1217_v20, 0.0  ;;  %v1234_v34 = vmax.f32 %v1218_v21, 0.0  ;;  %v1235_v35 = vmax.f32 %v1219_v23, 0.0 }
 0x2dc   : > { %v1236_v36 = vmax.f32 %v1220_v24, 0.0  ;;  %v1237_v37 = vmax.f32 %v1221_v25, 0.0  ;;  %v1238_v38 = vmax.f32 %v1222_v26, 0.0  ;;  %v1239_v39 = vmax.f32 %v1223_v27, 0.0 }
 0x2dd   : > { %v1240_v40 = vmax.f32 %v1224_v28, 0.0 }
 0x2de   : > { %1902 = vmatmul.mubr.msk.f32.gmra.mrb[20].mxu0 %vm656_vm2, %v1228_v29 }
 0x2df   : > { %1904 = vmatprep.mubr.msk.f32.mxu0 %vm656_vm2, %v1229_v30 }
 0x2e2   : > { %1905 = vmatmul.mubr.msk.f32.gmra.mrb[22].mxu0 %vm656_vm2, %v1230_v22 }
 0x2e3   : > { %1907 = vmatprep.mubr.msk.f32.mxu0 %vm656_vm2, %v1231_v31 }
 0x2e6   : > { %1908 = vmatmul.mubr.msk.f32.gmra.mrb[24].mxu0 %vm656_vm2, %v1232_v32 }
 0x2e7   : > { %1910 = vmatprep.mubr.msk.f32.mxu0 %vm656_vm2, %v1233_v33 }
 0x2ea   : > { %1911 = vmatmul.mubr.msk.f32.gmra.mrb[26].mxu0 %vm656_vm2, %v1234_v34 }
 0x2eb   : > { %1913 = vmatprep.mubr.msk.f32.mxu0 %vm656_vm2, %v1235_v35 }
 0x2ee   : > { %1914 = vmatmul.mubr.msk.f32.gmra.mrb[28].mxu0 %vm656_vm2, %v1236_v36 }
 0x2ef   : > { %1916 = vmatprep.mubr.msk.f32.mxu0 %vm656_vm2, %v1237_v37 }
 0x2f2   : > { %1917 = vmatmul.mubr.msk.f32.gmra.mrb[30].mxu0 %vm656_vm2, %v1238_v38 }
 0x2f3   : > { %1919 = vmatprep.mubr.msk.f32.mxu0 %vm656_vm2, %v1239_v39 }
 0x2f6   : > { %1920 = vmatmul.mubr.msk.f32.gmra.mrb[32].mxu0 %vm656_vm2, %v1240_v40 }
 0x3ad   : > { %v1900_v42 = vpop.f32.mrb[18].mxu0 }
 0x3ae   : > { %v1372_v43 = vadd.f32 %v1900_v42, %v2365_v41  ;;  %v1366_v44 = vpop.f32.mrb[19].mxu0 }
 0x3af   : > { %v1367_v45 = vadd.f32 %v2365_v41, %v1366_v44 }
 0x3b0   : > { %1446 = vst.msk [vmem:[%s2372_s14 + $0x8] sm:$0xff] %vm656_vm2, %v1372_v43  ;;  %v1462_v50 = vsel %vm656_vm2, %v1372_v43, -inf }
 0x3b1   : > { %1445 = vst.msk [vmem:[%s2372_s14] sm:$0xff] %vm656_vm2, %v1367_v45  ;;  %v1903_v46 = vpop.f32.mrb[20].mxu0  ;;  %v1461_v52 = vsel %vm656_vm2, %v1367_v45, -inf }
 0x3b2   : > { %v1382_v47 = vadd.f32 %v1903_v46, %v2365_v41  ;;  %v1376_v48 = vpop.f32.mrb[21].mxu0 }
 0x3b3   : > { %v1377_v49 = vadd.f32 %v2365_v41, %v1376_v48 }
 0x3b4   : > { %1448 = vst.msk [vmem:[%s2372_s14 + $0x18] sm:$0xff] %vm656_vm2, %v1382_v47  ;;  %v1465_v51 = vsel %vm656_vm2, %v1382_v47, -inf }
 0x3b5   : > { %v1466_v53 = vmax.f32 %v1462_v50, %v1465_v51  ;;  %1447 = vst.msk [vmem:[%s2372_s14 + $0x10] sm:$0xff] %vm656_vm2, %v1377_v49  ;;  %v1463_v54 = vsel %vm656_vm2, %v1377_v49, -inf  ;;  %v1906_v55 = vpop.f32.mrb[22].mxu0 }
 0x3b6   : > { %v1464_v56 = vmax.f32 %v1461_v52, %v1463_v54  ;;  %v1392_v57 = vadd.f32 %v1906_v55, %v2365_v41  ;;  %v1386_v58 = vpop.f32.mrb[23].mxu0 }
 0x3b7   : > { %v1387_v59 = vadd.f32 %v2365_v41, %v1386_v58 }
 0x3b8   : > { %1450 = vst.msk [vmem:[%s2372_s14 + $0x28] sm:$0xff] %vm656_vm2, %v1392_v57  ;;  %v1469_v60 = vsel %vm656_vm2, %v1392_v57, -inf }
 0x3b9   : > { %v1470_v61 = vmax.f32 %v1466_v53, %v1469_v60  ;;  %1449 = vst.msk [vmem:[%s2372_s14 + $0x20] sm:$0xff] %vm656_vm2, %v1387_v59  ;;  %v1467_v62 = vsel %vm656_vm2, %v1387_v59, -inf  ;;  %v1909_v63 = vpop.f32.mrb[24].mxu0 }
 0x3ba   : > { %v1468_v0 = vmax.f32 %v1464_v56, %v1467_v62  ;;  %v1402_v1 = vadd.f32 %v1909_v63, %v2365_v41  ;;  %v1396_v2 = vpop.f32.mrb[25].mxu0 }
 0x3bb   : > { %v1397_v3 = vadd.f32 %v2365_v41, %v1396_v2 }
 0x3bc   : > { %1452 = vst.msk [vmem:[%s2372_s14 + $0x38] sm:$0xff] %vm656_vm2, %v1402_v1  ;;  %v1473_v4 = vsel %vm656_vm2, %v1402_v1, -inf }
 0x3bd   : > { %v1474_v5 = vmax.f32 %v1470_v61, %v1473_v4  ;;  %1451 = vst.msk [vmem:[%s2372_s14 + $0x30] sm:$0xff] %vm656_vm2, %v1397_v3  ;;  %v1471_v6 = vsel %vm656_vm2, %v1397_v3, -inf  ;;  %v1912_v7 = vpop.f32.mrb[26].mxu0 }
 0x3be   : > { %v1472_v8 = vmax.f32 %v1468_v0, %v1471_v6  ;;  %v1412_v9 = vadd.f32 %v1912_v7, %v2365_v41  ;;  %v1406_v10 = vpop.f32.mrb[27].mxu0 }
 0x3bf   : > { %v1407_v11 = vadd.f32 %v2365_v41, %v1406_v10 }
 0x3c0   : > { %v1475_v12 = vmax.f32 %v1472_v8, %v1474_v5  ;;  %1454 = vst.msk [vmem:[%s2372_s14 + $0x48] sm:$0xff] %vm656_vm2, %v1412_v9  ;;  %v1483_v19 = vsel %vm656_vm2, %v1412_v9, -inf }
 0x3c1   : > { %1453 = vst.msk [vmem:[%s2372_s14 + $0x40] sm:$0xff] %vm656_vm2, %v1407_v11  ;;  %v1915_v13 = vpop.f32.mrb[28].mxu0  ;;  %v1482_v21 = vsel %vm656_vm2, %v1407_v11, -inf }
 0x3c2   : > { %v1476_v14 = vrot.slane %v1475_v12, 4  ;;  %v1422_v15 = vadd.f32 %v1915_v13, %v2365_v41  ;;  %v1416_v16 = vpop.f32.mrb[29].mxu0 }
 0x3c3   : > { %v1417_v17 = vadd.f32 %v2365_v41, %v1416_v16 }
 0x3c4   : > { %v1477_v18 = vmax.f32 %v1475_v12, %v1476_v14  ;;  %1456 = vst.msk [vmem:[%s2372_s14 + $0x58] sm:$0xff] %vm656_vm2, %v1422_v15  ;;  %v1486_v20 = vsel %vm656_vm2, %v1422_v15, -inf }
 0x3c5   : > { %v1487_v23 = vmax.f32 %v1483_v19, %v1486_v20  ;;  %1455 = vst.msk [vmem:[%s2372_s14 + $0x50] sm:$0xff] %vm656_vm2, %v1417_v17  ;;  %v1484_v24 = vsel %vm656_vm2, %v1417_v17, -inf  ;;  %v1918_v25 = vpop.f32.mrb[30].mxu0 }
 0x3c6   : > { %v1478_v26 = vrot.slane %v1477_v18, 2  ;;  %v1485_v27 = vmax.f32 %v1482_v21, %v1484_v24  ;;  %v1432_v28 = vadd.f32 %v1918_v25, %v2365_v41  ;;  %v1426_v29 = vpop.f32.mrb[31].mxu0 }
 0x3c7   : > { %v1427_v30 = vadd.f32 %v2365_v41, %v1426_v29 }
 0x3c8   : > { %v1479_v22 = vmax.f32 %v1477_v18, %v1478_v26  ;;  %1458 = vst.msk [vmem:[%s2372_s14 + $0x68] sm:$0xff] %vm656_vm2, %v1432_v28  ;;  %v1490_v31 = vsel %vm656_vm2, %v1432_v28, -inf }
 0x3c9   : > { %v1491_v32 = vmax.f32 %v1487_v23, %v1490_v31  ;;  %1457 = vst.msk [vmem:[%s2372_s14 + $0x60] sm:$0xff] %vm656_vm2, %v1427_v30  ;;  %v1488_v33 = vsel %vm656_vm2, %v1427_v30, -inf  ;;  %v1921_v34 = vpop.f32.mrb[32].mxu0 }
 0x3ca   : > { %v1480_v35 = vrot.slane %v1479_v22, 1  ;;  %v1489_v36 = vmax.f32 %v1485_v27, %v1488_v33  ;;  %v1442_v37 = vadd.f32 %v1921_v34, %v2365_v41  ;;  %v1436_v38 = vpop.f32.mrb[33].mxu0 }
 0x3cb   : > { %v1437_v39 = vadd.f32 %v2365_v41, %v1436_v38 }
 0x3cc   : > { %v1481_v40 = vmax.f32 %v1479_v22, %v1480_v35  ;;  %1460 = vst.msk [vmem:[%s2372_s14 + $0x78] sm:$0xff] %vm656_vm2, %v1442_v37  ;;  %v1494_v42 = vsel %vm656_vm2, %v1442_v37, -inf }
 0x3cd   : > { %v1495_v43 = vmax.f32 %v1491_v32, %v1494_v42  ;;  %1459 = vst.msk [vmem:[%s2372_s14 + $0x70] sm:$0xff] %vm656_vm2, %v1437_v39  ;;  %v1492_v44 = vsel %vm656_vm2, %v1437_v39, -inf  ;;  %s1997_s14 = scalar_lea.vmem %s2448_s25, 32 }
 0x3ce   : > { %v1493_v45 = vmax.f32 %v1489_v36, %v1492_v44  ;;  %1504 = vst.msk [vmem:[%s383_s16] sm:$0x1] %vm1503_vm5, %v1481_v40  ;;  %p1998_p11 = scmp.ne.s32.totalorder %s2448_s25, %s1997_s14  ;;  %p2005_p1 = scmp.lt.s32.totalorder %s2003_s24, %s1997_s14 }
 0x3d0   : > { %v1496_v46 = vmax.f32 %v1493_v45, %v1495_v43  ;;  %p1999_p12 = pnand %p1998_p11, %p2166_p5  ;;  %p2006_p2 = por %p2005_p1, %p2004_p0 }
 0x3d2   : > { %v1497_v41 = vrot.slane %v1496_v46, 4  ;;  %p2000_p13 = pneg %p1999_p12 }
 0x3d4   : > { %v1498_v47 = vmax.f32 %v1496_v46, %v1497_v41  ;;  %p2007_p3 = pnand %p2006_p2, %p2000_p13 }
 0x3d6   : > { %v1499_v48 = vrot.slane %v1498_v47, 2 }
 0x3d8   : > { %v1500_v49 = vmax.f32 %v1498_v47, %v1499_v48 }
 0x3da   : > { %v1501_v50 = vrot.slane %v1500_v49, 1 }
 0x3dc   : > { %v1502_v51 = vmax.f32 %v1500_v49, %v1501_v50 }
 0x3de   : > { %1505 = vst.msk [vmem:[%s383_s16 + $0x1] sm:$0x1] %vm1503_vm5, %v1502_v51 }
 0x3df   : > { %2010 = shalt.err (!%p2007_p3)
}
 0x3e0   : > { %s2011_s12 = scalar_lea.hbm %s2446_s22, 32  ;;  %s2015_s30 = scalar_lea.hbm %s2504_s10, 64 }
 0x3e1   : > { %p2012_p4 = scmp.ne.s32.totalorder %s2446_s22, %s2011_s12  ;;  %p2016_p9 = scmp.lt.u32.totalorder %s2446_s22, %s2504_s10 }
 0x3e2   : > { %p2017_p10 = scmp.lt.u32.totalorder %s2015_s30, %s2011_s12  ;;  %p2019_p12 = scmp.lt.u32.totalorder %s2011_s12, %s2446_s22 }
 0x3e3   : > { %p2013_p7 = pnand %p2012_p4, %p2166_p5 }
 0x3e4   : > { %p2018_p11 = por %p2017_p10, %p2016_p9 }
 0x3e5   : > { %p2014_p8 = pneg %p2013_p7 }
 0x3e6   : > { %p2020_p13 = por %p2019_p12, %p2018_p11 }
 0x3e8   : > { %p2021_p0 = pnand %p2020_p13, %p2014_p8 }
 0x3ea   : > { %2024 = shalt.err (!%p2021_p0)
}
 0x3eb   : > { %s2066_s14 = smov 16   ;;  %s2067_s24 = smov 1  }
 0x3ec   : > { %1952 = dma.vmem_to_hbm [thread:$0]  (%p2166_p5), %s2448_s25, 32, %s2446_s22, %s2453_s13, %s2066_s14, %s2066_s14, %s2067_s24  }
 0x3ed PF: > { %p1958_p1 = scmp.ge.s32.totalorder %s2059_s20, 2  ;;  %s1545_s16 = sand.u32 1, %s2047_s17  }
 0x3ee   : > { %s1546_s12 = scalar_lea.sflag [#allocation3], %s1545_s16 }
 0x3ef   : > { %p1955_p2 = pnand %p1958_p1, %p2170_p6 }
 0x3f1   : > { %2042 = dma.done.wait (!%p1955_p2), %s1546_s12, 32  }
 0x3f2   : > { %2044 = vsyncadd (!%p1955_p2), %s1546_s12, 4294967264  ;;  %p22_p3 = scmp.ge.s32.totalorder %s2153_s23, 4   ;;  %s2510_s17 = smov %s2051_s18 }
 0x3f3   : > { %s2511_s18 = smov %s2055_s19  ;;  %s2512_s19 = smov %s2164_s26 }
 0x3f4   : > { %s2513_s20 = smov %s2153_s23  ;;  %24 = sbr.rel (!%p22_p3) target bundleno = 3 (0x3), region = 107 }
 0x3fb   :  { %1560 = vsyncpa [#allocation3], 1 }
 0x3fc   :  { %1562 = vsyncpa [#allocation3 + $0x1], 1 }

</bundles_post_ra>
